<compile_context>
chip_gen: v6e
topology: v6e:2x2x1
jax: 0.10.0
libtpu: 0.0.40
codegen_flags: <defaults>
</compile_context>

<pallas_src>
from typing import NamedTuple, Optional

import jax
import jax.numpy as jnp
from jax.experimental import pallas as pl
from jax.experimental.pallas import tpu as pltpu

_LANE = 128


def _round_up(x: int, m: int) -> int:
    return (x + m - 1) // m * m


def _sublane_pack(dtype) -> int:
    # Packed-sublane tile height: 8 for f32, 16 for bf16, 32 for int8/fp8.
    return max(8, 32 // jnp.dtype(dtype).itemsize)


def _vmem_capacity_bytes() -> int:
    try:
        return int(pltpu.get_tpu_info().vmem_capacity_bytes)
    except Exception:
        return 64 * 1024 * 1024  # conservative default (v7x per-TC VMEM)


def _sigmoid_f32(h):
    # sigmoid(h) == 0.5*tanh(0.5*h)+0.5 : one EUP push instead of exp + recip.
    return 0.5 * jnp.tanh(0.5 * h) + 0.5


# ----------------------------------------------------------------------------
# Kernels
# ----------------------------------------------------------------------------
def _mlp_kernel_resident(x_ref, w1_ref, b1_ref, w2_ref, b2_ref, o_ref):
    # fc1: (TB, Din) @ (Din, Dh), f32 accumulation on the MXU.
    h = jnp.dot(x_ref[...], w1_ref[...], preferred_element_type=jnp.float32)
    h = _sigmoid_f32(h + b1_ref[...])                     # bias + sigmoid in f32
    # fc2: (TB, Dh) @ (Dh, Dout); h downcast to the MXU operand dtype.
    y = jnp.dot(h.astype(w2_ref.dtype), w2_ref[...],
                preferred_element_type=jnp.float32)
    o_ref[...] = (y + b2_ref[...]).astype(o_ref.dtype)


def _mlp_kernel_dh_tiled(x_ref, w1_ref, b1_ref, w2_ref, b2_ref, o_ref, acc_ref):
    # Streams W1/W2 tiles over the hidden dim and accumulates fc2 in f32.
    k = pl.program_id(1)

    @pl.when(k == 0)
    def _():
        acc_ref[...] = jnp.zeros_like(acc_ref)

    h = jnp.dot(x_ref[...], w1_ref[...], preferred_element_type=jnp.float32)
    h = _sigmoid_f32(h + b1_ref[...])
    acc_ref[...] += jnp.dot(h.astype(w2_ref.dtype), w2_ref[...],
                            preferred_element_type=jnp.float32)

    @pl.when(k == pl.num_programs(1) - 1)
    def _():
        o_ref[...] = (acc_ref[...] + b2_ref[...]).astype(o_ref.dtype)


# ----------------------------------------------------------------------------
# Host-side wrapper
# ----------------------------------------------------------------------------
class MLPParams(NamedTuple):
    w1p: jax.Array   # (din_p, dh_p)   compute dtype, zero-padded
    b1p: jax.Array   # (1, dh_p)       f32
    w2p: jax.Array   # (dh_p, dout_p)  compute dtype, zero-padded
    b2p: jax.Array   # (1, dout_p)     f32
    d_in: int
    d_hidden: int
    d_out: int


def prepare_mlp_params(w1_t, b1, w2_t, b2, compute_dtype=jnp.bfloat16) -> MLPParams:
    """Pad weights to 128-lane multiples and cast ONCE (outside the per-call path).

    Zero padding is exact: padded hidden columns produce sigmoid(0+0)=0.5 but
    multiply all-zero fc2 rows, so they contribute nothing to the output.
    """
    d_in, d_hidden = w1_t.shape
    d_out = w2_t.shape[1]
    assert w2_t.shape[0] == d_hidden and b1.shape == (d_hidden,) and b2.shape == (d_out,)
    din_p, dh_p, dout_p = (_round_up(d, _LANE) for d in (d_in, d_hidden, d_out))
    cdt = jnp.dtype(compute_dtype)
    w1p = jnp.zeros((din_p, dh_p), cdt).at[:d_in, :d_hidden].set(w1_t.astype(cdt))
    w2p = jnp.zeros((dh_p, dout_p), cdt).at[:d_hidden, :d_out].set(w2_t.astype(cdt))
    b1p = jnp.zeros((1, dh_p), jnp.float32).at[0, :d_hidden].set(b1.astype(jnp.float32))
    b2p = jnp.zeros((1, dout_p), jnp.float32).at[0, :d_out].set(b2.astype(jnp.float32))
    return MLPParams(w1p, b1p, w2p, b2p, d_in, d_hidden, d_out)


def mlp_forward(x, params: MLPParams, *, block_b: int = 512,
                block_dh: Optional[int] = None, dh_tiling: Optional[bool] = None):
    """x: (B, d_in) -> (B, d_out) in x.dtype. params from prepare_mlp_params()."""
    B, d_in = x.shape
    assert d_in == params.d_in
    din_p, dh_p = params.w1p.shape
    dout_p = params.w2p.shape[1]
    d_out = params.d_out
    compute_dtype = params.w1p.dtype
    out_dtype = x.dtype
    cd = jnp.dtype(compute_dtype).itemsize
    ob = jnp.dtype(out_dtype).itemsize

    # --- batch tile: multiple of the packed-sublane tile for the MXU dtype;
    #     shrink until the grid has >= 2 steps (keeps both v7x TCs busy and
    #     gives the X/O double-buffer something to pipeline).
    pack = _sublane_pack(compute_dtype)
    tb = min(_round_up(block_b, pack), _round_up(B, pack))
    while _round_up(B, tb) // tb < 2 and tb > pack:
        tb = max(pack, _round_up(tb // 2, pack))
    b_p = _round_up(B, tb)
    num_b = b_p // tb

    # --- generation-aware VMEM budget: ~85% of physical VMEM.
    vmem_cap = int(_vmem_capacity_bytes() * 0.85)

    weight_bytes = (din_p * dh_p + dh_p * dout_p) * cd + (dh_p + dout_p) * 4
    x_bufs = 3 if (din_p + dout_p) <= 512 else 2   # extra X buffer at small dims
    io_bytes = x_bufs * tb * din_p * cd + 2 * tb * dout_p * ob
    temp_bytes = tb * dh_p * 4 + tb * dout_p * 4   # f32 intermediates
    resident_bytes = weight_bytes + io_bytes + temp_bytes

    use_tiled = (resident_bytes > int(0.7 * vmem_cap)) if dh_tiling is None \
        else bool(dh_tiling)

    # --- pad / cast x only when actually needed (ragged tail or unaligned d_in).
    if b_p == B and din_p == d_in:
        xp = x if x.dtype == compute_dtype else x.astype(compute_dtype)
    else:
        xp = jnp.zeros((b_p, din_p), compute_dtype).at[:B, :d_in].set(
            x.astype(compute_dtype))

    flops = 2 * b_p * din_p * dh_p + 2 * b_p * dh_p * dout_p

    if not use_tiled:
        # ------------------------------------------------------------------
        # Resident-weights path: weights stay in VMEM (single-buffered),
        # X/O tiles stream over a 1-D batch grid.
        # ------------------------------------------------------------------
        vmem_limit = int(min(max(1.25 * resident_bytes, 32 << 20), vmem_cap))
        cost = pl.CostEstimate(
            flops=flops,
            transcendentals=b_p * dh_p,
            bytes_accessed=b_p * din_p * cd + weight_bytes + b_p * dout_p * ob)

        def build(resident_pipe, x_pipe):
            def spec(shape, imap, pipe=None):
                if pipe is None:
                    return pl.BlockSpec(shape, imap)
                return pl.BlockSpec(shape, imap, pipeline_mode=pipe)
            return pl.pallas_call(
                _mlp_kernel_resident,
                out_shape=jax.ShapeDtypeStruct((b_p, dout_p), out_dtype),
                grid=(num_b,),
                in_specs=[
                    spec((tb, din_p), lambda i: (i, 0), x_pipe),        # X (streamed)
                    spec((din_p, dh_p), lambda i: (0, 0), resident_pipe),   # W1
                    spec((1, dh_p), lambda i: (0, 0), resident_pipe),        # b1
                    spec((dh_p, dout_p), lambda i: (0, 0), resident_pipe),   # W2
                    spec((1, dout_p), lambda i: (0, 0), resident_pipe),      # b2
                ],
                out_specs=pl.BlockSpec((tb, dout_p), lambda i: (i, 0)),  # lane-dense
                compiler_params=pltpu.CompilerParams(
                    dimension_semantics=("parallel",),
                    vmem_limit_bytes=vmem_limit),
                cost_estimate=cost,
            )

        try:
            out_p = build(pl.Buffered(1),
                          pl.Buffered(x_bufs) if x_bufs != 2 else None)(
                xp, params.w1p, params.b1p, params.w2p, params.b2p)
        except Exception:
            # Fallback if this JAX build rejects pipeline_mode hints.
            out_p = build(None, None)(xp, params.w1p, params.b1p,
                                      params.w2p, params.b2p)
    else:
        # ------------------------------------------------------------------
        # dh-tiled fallback (v7x / large d_in): stream W1/W2 tiles over the
        # hidden dim, accumulate fc2 into an f32 VMEM scratch.
        # ------------------------------------------------------------------
        def tiled_bytes(td):
            return (2 * (din_p * td + td * dout_p) * cd + 2 * td * 4 + dout_p * 4
                    + 2 * tb * din_p * cd + 2 * tb * dout_p * ob
                    + tb * dout_p * 4 + tb * td * 4)

        if block_dh is None:
            block_dh = 128
            for cand in (1024, 512, 256):
                if dh_p % cand == 0 and tiled_bytes(cand) <= int(0.8 * vmem_cap):
                    block_dh = cand
                    break
        tdh = min(block_dh, dh_p)
        assert dh_p % tdh == 0 and tdh % _LANE == 0
        num_dh = dh_p // tdh

        vmem_limit = int(min(max(1.25 * tiled_bytes(tdh), 32 << 20), vmem_cap))
        cost = pl.CostEstimate(
            flops=flops,
            transcendentals=b_p * dh_p,
            bytes_accessed=(b_p * din_p * cd + num_b * weight_bytes
                            + b_p * dout_p * ob))

        out_p = pl.pallas_call(
            _mlp_kernel_dh_tiled,
            out_shape=jax.ShapeDtypeStruct((b_p, dout_p), out_dtype),
            grid=(num_b, num_dh),                     # reduction axis (dh) last
            in_specs=[
                pl.BlockSpec((tb, din_p), lambda i, k: (i, 0)),     # X (const over k)
                pl.BlockSpec((din_p, tdh), lambda i, k: (0, k)),    # W1 tile
                pl.BlockSpec((1, tdh), lambda i, k: (0, k)),        # b1 tile
                pl.BlockSpec((tdh, dout_p), lambda i, k: (k, 0)),   # W2 tile
                pl.BlockSpec((1, dout_p), lambda i, k: (0, 0)),     # b2
            ],
            out_specs=pl.BlockSpec((tb, dout_p), lambda i, k: (i, 0)),
            scratch_shapes=[pltpu.VMEM((tb, dout_p), jnp.float32)],
            compiler_params=pltpu.CompilerParams(
                dimension_semantics=("parallel", "arbitrary"),
                vmem_limit_bytes=vmem_limit),
            cost_estimate=cost,
        )(xp, params.w1p, params.b1p, params.w2p, params.b2p)

    if b_p == B and dout_p == d_out:
        return out_p                       # aligned fast path: no slice copy
    return out_p[:B, :d_out]


def init_mlp_params(key, d_in, d_out, dtype=jnp.float32):
    """Deterministic init mimicking nn.Linear's uniform(-1/sqrt(fan_in), 1/sqrt(fan_in))."""
    k1, k2, k3, k4 = jax.random.split(key, 4)
    d_hidden = 2 * d_in
    bound1 = 1.0 / jnp.sqrt(d_in)
    bound2 = 1.0 / jnp.sqrt(d_hidden)
    # Stored already transposed relative to PyTorch's (out, in) convention.
    w1_t = jax.random.uniform(k1, (d_in, d_hidden), dtype, -bound1, bound1)
    b1 = jax.random.uniform(k2, (d_hidden,), dtype, -bound1, bound1)
    w2_t = jax.random.uniform(k3, (d_hidden, d_out), dtype, -bound2, bound2)
    b2 = jax.random.uniform(k4, (d_out,), dtype, -bound2, bound2)
    return w1_t, b1, w2_t, b2


if __name__ == "__main__":
    key = jax.random.PRNGKey(0)
    kx, kp, kx2, kp2 = jax.random.split(key, 4)

    # --- Case 1: small, unaligned shapes (pad/slice path). ---
    batch, d_in, d_out = 24, 32, 16
    x = jax.random.normal(kx, (batch, d_in), jnp.float32)
    w1_t, b1, w2_t, b2 = init_mlp_params(kp, d_in, d_out)
    ref = jax.nn.sigmoid(x @ w1_t + b1) @ w2_t + b2

    # 1a) exact f32 path (strict check).
    p_f32 = prepare_mlp_params(w1_t, b1, w2_t, b2, compute_dtype=jnp.float32)
    out_f32 = jax.block_until_ready(mlp_forward(x, p_f32, block_b=8))
    assert out_f32.shape == (batch, d_out)
    assert jnp.allclose(out_f32, ref, atol=1e-5, rtol=1e-5)

    # 1b) performance path: bf16 MXU operands, f32 accumulation.
    p_bf16 = prepare_mlp_params(w1_t, b1, w2_t, b2, compute_dtype=jnp.bfloat16)
    out_bf16 = jax.block_until_ready(mlp_forward(x, p_bf16))
    assert out_bf16.shape == (batch, d_out)
    assert jnp.allclose(out_bf16, ref, atol=5e-2, rtol=5e-2)

    # --- Case 2: tile-aligned shapes -> no pad / no slice fast path. ---
    B2, din2, dout2 = 256, 128, 128
    x2 = jax.random.normal(kx2, (B2, din2), jnp.float32)
    w1b, b1b, w2b, b2b = init_mlp_params(kp2, din2, dout2)
    ref2 = jax.nn.sigmoid(x2 @ w1b + b1b) @ w2b + b2b
    p2 = prepare_mlp_params(w1b, b1b, w2b, b2b, compute_dtype=jnp.bfloat16)
    out2 = jax.block_until_ready(mlp_forward(x2, p2, block_b=128))
    assert out2.shape == (B2, dout2)
    assert jnp.allclose(out2, ref2, atol=5e-2, rtol=5e-2)

    # --- Case 3: force the dh-tiled (streamed-weights) fallback used when the
    #     resident weights would not fit VMEM (e.g. large d_in on v7x). ---
    p3 = prepare_mlp_params(w1b, b1b, w2b, b2b, compute_dtype=jnp.float32)
    out3 = jax.block_until_ready(
        mlp_forward(x2, p3, block_b=128, dh_tiling=True, block_dh=128))
    assert out3.shape == (B2, dout2)
    assert jnp.allclose(out3, ref2, atol=1e-4, rtol=1e-4)

    print("KERNEL_OK")
</pallas_src>

<mosaic_0001>
module attributes {stable_mosaic.version = 11 : i64} {
  func.func @_mlp_kernel_resident(%arg0: i32, %arg1: memref<8x128xf32, #tpu.memory_space<vmem>>, %arg2: memref<128x128xf32, #tpu.memory_space<vmem>>, %arg3: memref<1x128xf32, #tpu.memory_space<vmem>>, %arg4: memref<128x128xf32, #tpu.memory_space<vmem>>, %arg5: memref<1x128xf32, #tpu.memory_space<vmem>>, %arg6: memref<8x128xf32, #tpu.memory_space<vmem>>) attributes {dimension_semantics = [#tpu.dimension_semantics<parallel>], iteration_bounds = array<i64: 3>, scalar_prefetch = 0 : i64, scratch_operands = 0 : i64, tpu.core_type = #tpu.core_type<tc>, window_params = [{transform_indices = @transform_0, window_bounds = array<i64: 8, 128>}, {pipeline_mode = #tpu.pipeline_mode<synchronous>, transform_indices = @transform_1, window_bounds = array<i64: 128, 128>}, {pipeline_mode = #tpu.pipeline_mode<synchronous>, transform_indices = @transform_2, window_bounds = array<i64: 1, 128>}, {pipeline_mode = #tpu.pipeline_mode<synchronous>, transform_indices = @transform_3, window_bounds = array<i64: 128, 128>}, {pipeline_mode = #tpu.pipeline_mode<synchronous>, transform_indices = @transform_4, window_bounds = array<i64: 1, 128>}, {transform_indices = @transform_5, window_bounds = array<i64: 8, 128>}]} {
    %c0 = arith.constant 0 : index
    %c0_0 = arith.constant 0 : index
    %0 = vector.load %arg1[%c0, %c0_0] : memref<8x128xf32, #tpu.memory_space<vmem>>, vector<8x128xf32>
    %c0_1 = arith.constant 0 : index
    %c0_2 = arith.constant 0 : index
    %1 = vector.load %arg2[%c0_1, %c0_2] : memref<128x128xf32, #tpu.memory_space<vmem>>, vector<128x128xf32>
    %cst = arith.constant dense<0.000000e+00> : vector<8x128xf32>
    %2 = tpu.matmul %0, %1, %cst {dimension_numbers = #tpu.dot_dimension_numbers<[1], [0], [0], [1], [0, 0, 1, 1], [], []>} : vector<8x128xf32>, vector<128x128xf32>, vector<8x128xf32> -> vector<8x128xf32>
    %c0_3 = arith.constant 0 : index
    %c0_4 = arith.constant 0 : index
    %3 = vector.load %arg3[%c0_3, %c0_4] : memref<1x128xf32, #tpu.memory_space<vmem>>, vector<1x128xf32>
    %4 = vector.broadcast %3 : vector<1x128xf32> to vector<8x128xf32>
    %5 = arith.addf %2, %4 : vector<8x128xf32>
    %cst_5 = arith.constant 5.000000e-01 : f32
    %6 = vector.broadcast %cst_5 : f32 to vector<8x128xf32>
    %7 = arith.mulf %6, %5 : vector<8x128xf32>
    %8 = math.tanh %7 : vector<8x128xf32>
    %cst_6 = arith.constant 5.000000e-01 : f32
    %9 = vector.broadcast %cst_6 : f32 to vector<8x128xf32>
    %10 = arith.mulf %9, %8 : vector<8x128xf32>
    %cst_7 = arith.constant 5.000000e-01 : f32
    %11 = vector.broadcast %cst_7 : f32 to vector<8x128xf32>
    %12 = arith.addf %10, %11 : vector<8x128xf32>
    %c0_8 = arith.constant 0 : index
    %c0_9 = arith.constant 0 : index
    %13 = vector.load %arg4[%c0_8, %c0_9] : memref<128x128xf32, #tpu.memory_space<vmem>>, vector<128x128xf32>
    %cst_10 = arith.constant dense<0.000000e+00> : vector<8x128xf32>
    %14 = tpu.matmul %12, %13, %cst_10 {dimension_numbers = #tpu.dot_dimension_numbers<[1], [0], [0], [1], [0, 0, 1, 1], [], []>} : vector<8x128xf32>, vector<128x128xf32>, vector<8x128xf32> -> vector<8x128xf32>
    %c0_11 = arith.constant 0 : index
    %c0_12 = arith.constant 0 : index
    %15 = vector.load %arg5[%c0_11, %c0_12] : memref<1x128xf32, #tpu.memory_space<vmem>>, vector<1x128xf32>
    %16 = vector.broadcast %15 : vector<1x128xf32> to vector<8x128xf32>
    %17 = arith.addf %14, %16 : vector<8x128xf32>
    %c0_13 = arith.constant 0 : index
    %c0_14 = arith.constant 0 : index
    %18 = vector.load %arg6[%c0_13, %c0_14] : memref<8x128xf32, #tpu.memory_space<vmem>>, vector<8x128xf32>
    tpu.vector_store %arg6[%c0_13, %c0_14], %17 {strides = array<i32>} : memref<8x128xf32, #tpu.memory_space<vmem>>, vector<8x128xf32>,
    return
  }
  func.func @transform_0(%arg0: i32) -> (i32, i32) {
    %c0_i32 = arith.constant 0 : i32
    %c0_i32_0 = arith.constant 0 : i32
    return %arg0, %c0_i32 : i32, i32
  }
  func.func @transform_1(%arg0: i32) -> (i32, i32) {
    %c0_i32 = arith.constant 0 : i32
    %c0_i32_0 = arith.constant 0 : i32
    %c0_i32_1 = arith.constant 0 : i32
    return %c0_i32, %c0_i32_0 : i32, i32
  }
  func.func @transform_2(%arg0: i32) -> (i32, i32) {
    %c0_i32 = arith.constant 0 : i32
    %c0_i32_0 = arith.constant 0 : i32
    %c0_i32_1 = arith.constant 0 : i32
    return %c0_i32, %c0_i32_0 : i32, i32
  }
  func.func @transform_3(%arg0: i32) -> (i32, i32) {
    %c0_i32 = arith.constant 0 : i32
    %c0_i32_0 = arith.constant 0 : i32
    %c0_i32_1 = arith.constant 0 : i32
    return %c0_i32, %c0_i32_0 : i32, i32
  }
  func.func @transform_4(%arg0: i32) -> (i32, i32) {
    %c0_i32 = arith.constant 0 : i32
    %c0_i32_0 = arith.constant 0 : i32
    %c0_i32_1 = arith.constant 0 : i32
    return %c0_i32, %c0_i32_0 : i32, i32
  }
  func.func @transform_5(%arg0: i32) -> (i32, i32) {
    %c0_i32 = arith.constant 0 : i32
    %c0_i32_0 = arith.constant 0 : i32
    return %arg0, %c0_i32 : i32, i32
  }
}

</mosaic_0001>

<bundles_post_ra>
// kernel: tpu_custom_call.1
= control target key start
LH: loop header
LB: loop body
LE: loop exit
PB: predicated region body
PF: predicated region fallthrough
CT: control target
= control target key end

     0   :  { %10 = vsyncpa [#allocation3], 0  ;;  %s1163_s0 = inlined_call_operand.hbm [shape: f32[24,128], index: 0, kind: input, shape index: {}]   ;;  %s1164_s1 = inlined_call_operand.hbm [shape: f32[128,128], index: 1, kind: input, shape index: {}]   ;;  %s1165_s2 = inlined_call_operand.vmem [shape: f32[1,128], index: 2, kind: input, shape index: {}]   ;;  %s1166_s3 = inlined_call_operand.hbm [shape: f32[128,128], index: 3, kind: input, shape index: {}]   ;;  %s1167_s4 = inlined_call_operand.vmem [shape: f32[1,128], index: 4, kind: input, shape index: {}]   ;;  %s1168_s5 = inlined_call_operand.hbm [shape: f32[24,128], index: 5, kind: output, shape index: {}]  }
   0x1   :  { %12 = vsyncpa [#allocation3 + $0x1], 0 }
   0x2   :  { %13 = vsyncpa [#allocation6], 0 }
   0x3   :  { %14 = vsyncpa [#allocation4], 0 }
   0x4   :  { %16 = vsyncpa [#allocation4 + $0x1], 0  ;;  %s947_s18 = smov 0   ;;  %s949_s19 = smov 0  }
   0x5   :  { %s951_s20 = smov 0   ;;  %s953_s21 = smov 0  }
   0x6 LB: > { %s968_s22 = sadd.s32 4294967295, %s907_s21   ;;  %s564_s23 = sadd.s32 4294967294, %s907_s21   ;;  %s907_s21 = sphi %s953_s21, %s1189_s21   ;;  %s903_s20 = sphi %s951_s20, %s1188_s20   ;;  %s899_s19 = sphi %s949_s19, %s1187_s19   ;;  %s895_s18 = sphi %s947_s18, %s1186_s18  }
   0x7   : > { %p42_p0 = scmp.ne.s32.totalorder %s899_s19, %s895_s18  ;;  %p1169_p1 = scmp.eq.s32.totalorder %s968_s22, 0 }
   0x8   : > { %p156_p3 = scmp.eq.s32.totalorder %s564_s23, 2  ;;  %p565_p5 = scmp.ge.s32.totalorder %s907_s21, 1 }
   0x9   : > { %p977_p4 = por %p1169_p1, %p42_p0  ;;  %p163_p7 = scmp.lt.s32.totalorder %s907_s21, 4 }
   0xa   : > { %p982_p6 = por %p156_p3, %p42_p0  ;;  %s909_s27 = smov [#allocation5]  }
   0xb   : > { %s1173_s24 = scalar_select %p977_p4, 1, 0 }
   0xc   : > { %s1174_s25 = scalar_select %p982_p6, 1, 0 }
   0xd   : > { %p987_p8 = pnand %p565_p5, %p163_p7  ;;  %s175_s28 = sshll.u32 %s909_s27, 4  ;;  %s176_s28 = int_to_ptr.vmem [resolvable:$true] %s175_s28 }
   0xe   : > { %s910_s30 = smov [#allocation7]   ;;  %s770_s7 = scalar_lea.vmem %s176_s28, 2048 }
   0xf   : > { %s1175_s26 = scalar_select %p987_p8, 1, 0 }
  0x10   : > { %p698_p9 = pneg %p987_p8  ;;  %s191_s6 = sshll.u32 %s910_s30, 4  ;;  %s192_s6 = int_to_ptr.vmem [resolvable:$true] %s191_s6 }
  0x11   : > { %p771_p12 = scmp.ne.s32.totalorder %s176_s28, %s770_s7  ;;  %p778_p3 = scmp.lt.s32.totalorder %s176_s28, %s176_s28 }
  0x12   : > { %p995_p10 = pnand %p698_p9, %p1169_p1  ;;  %p779_p5 = scmp.lt.s32.totalorder %s770_s7, %s770_s7 }
  0x14   : > { %p761_p11 = pneg %p995_p10  ;;  %p780_p7 = por %p779_p5, %p778_p3 }
  0x16   : > { %p773_p13 = pnand %p771_p12, %p761_p11 }
  0x18   : > { %p774_p0 = pneg %p773_p13 }
  0x1a   : > { %p781_p9 = pnand %p780_p7, %p774_p0 }
  0x1c   : > { %784 = shalt.err (!%p781_p9)
}
  0x1d   : > { %s911_s8 = smov 128   ;;  %s912_s9 = smov 8  }
  0x1e   : > { %701 = dma.hbm_to_vmem [thread:$0]  (!%p995_p10), %s1164_s1, 2048, %s176_s28, [#allocation6], %s911_s8, %s911_s8, %s912_s9  }
  0x1f   : > { %s796_s12 = scalar_lea.vmem %s192_s6, 2048  ;;  %p804_p2 = scmp.lt.s32.totalorder %s192_s6, %s192_s6 }
  0x20   : > { %p797_p1 = scmp.ne.s32.totalorder %s192_s6, %s796_s12  ;;  %p805_p6 = scmp.lt.s32.totalorder %s796_s12, %s796_s12 }
  0x22   : > { %p799_p12 = pnand %p797_p1, %p761_p11  ;;  %p806_p3 = por %p805_p6, %p804_p2 }
  0x24   : > { %p800_p13 = pneg %p799_p12 }
  0x26   : > { %p807_p0 = pnand %p806_p3, %p800_p13 }
  0x28   : > { %810 = shalt.err (!%p807_p0)
}
  0x29   : > { %704 = dma.hbm_to_vmem [thread:$0]  (!%p995_p10), %s1166_s3, 2048, %s192_s6, [#allocation6], %s911_s8, %s911_s8, %s912_s9  }
  0x2a   : > { %s1018_s15 = sadd.s32 1, %s907_s21   ;;  %s29_s16 = sadd.s32 1, %s903_s20 }
  0x2b   : > { %s26_s17 = ssub.s32 %s907_s21, %s1018_s15  ;;  %p36_p1 = scmp.ne.s32.totalorder %s903_s20, %s899_s19 }
  0x2c   : > { %p27_p2 = scmp.eq.s32.totalorder %s26_s17, 0  ;;  %p37_p6 = scmp.eq.s32.totalorder %s907_s21, 0 }
  0x2d   : > { %p1177_p11 = scmp.eq.s32.totalorder %s968_s22, 2  ;;  %p715_p7 = scmp.lt.s32.totalorder %s907_s21, 3 }
  0x2e   : > { %s1034_s27 = scalar_select %p27_p2, %s903_s20, %s29_s16  }
  0x2f   : > { %p1028_p5 = por %p1177_p11, %p36_p1  ;;  %p38_p9 = por %p37_p6, %p36_p1 }
  0x30   : > { %s208_s28 = sand.u32 1, %s903_s20   ;;  %s570_s30 = sshll.u32 %s907_s21, 7 }
  0x31   : > { %s1178_s23 = scalar_select %p1028_p5, 1, 0 }
  0x32   : > { %s569_s29 = sshll.u32 %s208_s28, 3  ;;  %s1041_s8 = scalar_lea.hbm %s1163_s0, %s570_s30 }
  0x33   : > { %s212_s9 = scalar_lea.vmem [#allocation2], %s569_s29  ;;  %p1043_p10 = pnand %p715_p7, %p38_p9 }
  0x34   : > { %s219_s10 = sshll.u32 %s212_s9, 4  ;;  %s209_s12 = scalar_lea.sflag [#allocation3], %s208_s28  ;;  %s220_s10 = int_to_ptr.vmem [resolvable:$true] %s219_s10 }
  0x35   : > { %s811_s13 = scalar_lea.hbm %s1041_s8, 128  ;;  %p813_p13 = pneg %p1043_p10 }
  0x36   : > { %p812_p12 = scmp.ne.s32.totalorder %s1041_s8, %s811_s13  ;;  %s816_s17 = scalar_lea.hbm %s1163_s0, 384 }
  0x37   : > { %p817_p1 = scmp.lt.s32.totalorder %s1041_s8, %s1163_s0  ;;  %p818_p2 = scmp.lt.s32.totalorder %s816_s17, %s811_s13 }
  0x38   : > { %p814_p3 = pnand %p813_p13, %p812_p12 }
  0x39   : > { %p819_p6 = por %p818_p2, %p817_p1 }
  0x3a   : > { %p815_p0 = pneg %p814_p3 }
  0x3c   : > { %p820_p11 = pnand %p819_p6, %p815_p0 }
  0x3e   : > { %823 = shalt.err (!%p820_p11)
}
  0x3f   : > { %s824_s6 = scalar_lea.vmem %s220_s10, 128  ;;  %s913_s28 = smov [#allocation2]  }
  0x40   : > { %p825_p7 = scmp.ne.s32.totalorder %s220_s10, %s824_s6  ;;  %s829_s7 = sshll.u32 %s913_s28, 4  ;;  %s830_s7 = int_to_ptr.vmem [resolvable:$false] %s829_s7 }
  0x41   : > { %s831_s9 = scalar_lea.vmem %s830_s7, 256  ;;  %p832_p12 = scmp.lt.s32.totalorder %s220_s10, %s830_s7 }
  0x42   : > { %p827_p9 = pnand %p825_p7, %p813_p13  ;;  %p833_p3 = scmp.lt.s32.totalorder %s831_s9, %s824_s6 }
  0x44   : > { %p828_p5 = pneg %p827_p9  ;;  %p834_p4 = por %p833_p3, %p832_p12 }
  0x46   : > { %p835_p8 = pnand %p834_p4, %p828_p5 }
  0x48   : > { %838 = shalt.err (!%p835_p8)
}
  0x49   : > { %708 = dma.hbm_to_vmem [thread:$0]  (!%p1043_p10), %s1041_s8, 128, %s220_s10, %s209_s12  }
  0x4a   : > { %p1180_p0 = scmp.ne.s32.totalorder %s1175_s26, 0 }
  0x4b   : > { %s1064_s13 = sand.u32 (!%p1180_p0), 1, %s899_s19   ;;  %p1181_p4 = scmp.ne.s32.totalorder (!%p1180_p0), %s1173_s24, 0 }
  0x4c   : > { %228 = sbr.rel (%p1180_p0) target bundleno = 542 (0x21e), region = 40  ;;  %s572_s14 = sshll.u32 (!%p1180_p0), %s1064_s13, 3 }
  0x4d   : > { %s231_s16 = scalar_lea.sflag (!%p1180_p0), [#allocation3], %s1064_s13  ;;  %s1070_s17 = scalar_lea.vmem (!%p1180_p0), [#allocation2], %s572_s14 }
  0x51   : > { %882 = dma.done.wait (%p1181_p4), %s231_s16, 128  }
  0x52   : > { %884 = vsyncadd (%p1181_p4), %s231_s16, 4294967168  ;;  %p1182_p8 = scmp.eq.s32.totalorder %s968_s22, 0 }
  0x54   : > { %886 = dma.done.wait (%p1182_p8), [#allocation6], 4096   ;;  %p1183_p5 = pmov %p1182_p8 }
  0x55   : > { %v914_v0 = vmov 0.0   ;;  %vm915_vm0 = vmmov 0   ;;  %v285_v1 = vld [vmem:[#allocation5 + $0x78] sm:$0xff]  ;;  %v284_v2 = vld [vmem:[#allocation5 + $0x70] sm:$0xff]  ;;  %v283_v3 = vld [vmem:[#allocation5 + $0x68] sm:$0xff]  ;;  %s579_s11 = sshll.u32 %s968_s22, 7 }
  0x56   : > { %888 = vsyncadd (%p1183_p5), [#allocation6], 4294963200  ;;  %616 = vmatprep.subr.mxu0 %v914_v0  ;;  %648 = vmatprep.mubr.msk.f32.mxu0 %vm915_vm0, %v914_v0  ;;  %v282_v4 = vld [vmem:[#allocation5 + $0x60] sm:$0xff]  ;;  %v382_v5 = vld [vmem:[#allocation7 + $0x78] sm:$0xff]  ;;  %s268_s12 = scalar_lea.vmem [#allocation8], %s572_s14  ;;  %s1127_s28 = scalar_lea.hbm %s1168_s5, %s579_s11 }
  0x57   : > { %651 = vmatprep.subr.mxu1 %v914_v0  ;;  %683 = vmatprep.mubr.msk.f32.mxu1 %vm915_vm0, %v914_v0  ;;  %v281_v6 = vld [vmem:[#allocation5 + $0x58] sm:$0xff]  ;;  %v381_v7 = vld [vmem:[#allocation7 + $0x70] sm:$0xff]  ;;  %v380_v8 = vld [vmem:[#allocation7 + $0x68] sm:$0xff]  ;;  %s475_s30 = sshll.u32 %s268_s12, 4  ;;  %s462_s7 = scalar_lea.sflag [#allocation4], %s1064_s13  ;;  %s476_s30 = int_to_ptr.vmem [resolvable:$true] %s475_s30 }
  0x58   : > { %617 = vmatpush3.msra.mxu0 %v285_v1  ;;  %652 = vmatpush3.msra.mxu1 %v382_v5  ;;  %v280_v9 = vld [vmem:[#allocation5 + $0x50] sm:$0xff]  ;;  %v379_v10 = vld [vmem:[#allocation7 + $0x60] sm:$0xff]  ;;  %v279_v11 = vld [vmem:[#allocation5 + $0x48] sm:$0xff]  ;;  %s839_s9 = scalar_lea.vmem %s476_s30, 128  ;;  %p1184_p13 = scmp.ne.s32.totalorder %s1178_s23, 0 }
  0x59   : > { %618 = vmatprep.subr.mxu0 %v914_v0  ;;  %653 = vmatprep.subr.mxu1 %v914_v0  ;;  %v278_v12 = vld [vmem:[#allocation5 + $0x40] sm:$0xff]  ;;  %v277_v13 = vld [vmem:[#allocation5 + $0x38] sm:$0xff]  ;;  %v276_v14 = vld [vmem:[#allocation5 + $0x30] sm:$0xff]  ;;  %p840_p10 = scmp.ne.s32.totalorder %s476_s30, %s839_s9  ;;  %s916_s22 = smov [#allocation8]  }
  0x5a   : > { %619 = vmatpush3.msra.mxu0 %v284_v2  ;;  %654 = vmatpush3.msra.mxu1 %v381_v7  ;;  %v275_v15 = vld [vmem:[#allocation5 + $0x28] sm:$0xff]  ;;  %v274_v16 = vld [vmem:[#allocation5 + $0x20] sm:$0xff]  ;;  %v273_v17 = vld [vmem:[#allocation5 + $0x18] sm:$0xff]  ;;  %s843_s16 = sshll.u32 %s916_s22, 4  ;;  %s844_s16 = int_to_ptr.vmem [resolvable:$false] %s843_s16 }
  0x5b   : > { %620 = vmatprep.subr.mxu0 %v914_v0  ;;  %655 = vmatprep.subr.mxu1 %v914_v0  ;;  %v272_v18 = vld [vmem:[#allocation5 + $0x10] sm:$0xff]  ;;  %v271_v19 = vld [vmem:[#allocation5 + $0x8] sm:$0xff]  ;;  %v270_v20 = vld [vmem:[#allocation5] sm:$0xff]  ;;  %p841_p1 = pnand %p840_p10, %p1184_p13  ;;  %s845_s14 = scalar_lea.vmem %s844_s16, 256 }
  0x5c   : > { %621 = vmatpush3.msra.mxu0 %v283_v3  ;;  %656 = vmatpush3.msra.mxu1 %v380_v8  ;;  %v269_v21 = vld [vmem:[%s1070_s17] sm:$0xff]  ;;  %v376_v24 = vld [vmem:[#allocation7 + $0x48] sm:$0xff]  ;;  %v375_v25 = vld [vmem:[#allocation7 + $0x40] sm:$0xff]  ;;  %p846_p6 = scmp.lt.s32.totalorder %s476_s30, %s844_s16  ;;  %p847_p11 = scmp.lt.s32.totalorder %s845_s14, %s839_s9 }
  0x5d   : > { %622 = vmatprep.subr.mxu0 %v914_v0  ;;  %657 = vmatprep.subr.mxu1 %v914_v0  ;;  %v378_v22 = vld [vmem:[#allocation7 + $0x58] sm:$0xff]  ;;  %v377_v23 = vld [vmem:[#allocation7 + $0x50] sm:$0xff]  ;;  %v372_v28 = vld [vmem:[#allocation7 + $0x28] sm:$0xff]  ;;  %p842_p2 = pneg %p841_p1 }
  0x5e   : > { %623 = vmatpush3.msra.mxu0 %v282_v4  ;;  %658 = vmatpush3.msra.mxu1 %v379_v10  ;;  %v374_v26 = vld [vmem:[#allocation7 + $0x38] sm:$0xff]  ;;  %v373_v27 = vld [vmem:[#allocation7 + $0x30] sm:$0xff]  ;;  %v371_v29 = vld [vmem:[#allocation7 + $0x20] sm:$0xff]  ;;  %p848_p7 = por %p847_p11, %p846_p6 }
  0x5f   : > { %624 = vmatprep.subr.mxu0 %v914_v0  ;;  %659 = vmatprep.subr.mxu1 %v914_v0  ;;  %v370_v30 = vld [vmem:[#allocation7 + $0x18] sm:$0xff]  ;;  %v369_v31 = vld [vmem:[#allocation7 + $0x10] sm:$0xff]  ;;  %v368_v32 = vld [vmem:[#allocation7 + $0x8] sm:$0xff] }
  0x60   : > { %625 = vmatpush3.msra.mxu0 %v281_v6  ;;  %660 = vmatpush3.msra.mxu1 %v378_v22  ;;  %v367_v33 = vld [vmem:[#allocation7] sm:$0xff]  ;;  %v576_v34 = vld [vmem:[%s1165_s2] ss:$0 sm:$0xff]  ;;  %p849_p9 = pnand %p848_p7, %p842_p2 }
  0x61   : > { %626 = vmatprep.subr.mxu0 %v914_v0  ;;  %661 = vmatprep.subr.mxu1 %v914_v0  ;;  %v577_v42 = vld [vmem:[%s1167_s4] ss:$0 sm:$0xff] }
  0x62   : > { %627 = vmatpush3.msra.mxu0 %v280_v9  ;;  %662 = vmatpush3.msra.mxu1 %v377_v23 }
  0x63   : > { %628 = vmatprep.subr.mxu0 %v914_v0  ;;  %663 = vmatprep.subr.mxu1 %v914_v0 }
  0x64   : > { %629 = vmatpush3.msra.mxu0 %v279_v11  ;;  %664 = vmatpush3.msra.mxu1 %v376_v24 }
  0x65   : > { %630 = vmatprep.subr.mxu0 %v914_v0  ;;  %665 = vmatprep.subr.mxu1 %v914_v0 }
  0x66   : > { %631 = vmatpush3.msra.mxu0 %v278_v12  ;;  %666 = vmatpush3.msra.mxu1 %v375_v25 }
  0x67   : > { %632 = vmatprep.subr.mxu0 %v914_v0  ;;  %667 = vmatprep.subr.mxu1 %v914_v0 }
  0x68   : > { %633 = vmatpush3.msra.mxu0 %v277_v13  ;;  %668 = vmatpush3.msra.mxu1 %v374_v26 }
  0x69   : > { %634 = vmatprep.subr.mxu0 %v914_v0  ;;  %669 = vmatprep.subr.mxu1 %v914_v0 }
  0x6a   : > { %635 = vmatpush3.msra.mxu0 %v276_v14  ;;  %670 = vmatpush3.msra.mxu1 %v373_v27 }
  0x6b   : > { %636 = vmatprep.subr.mxu0 %v914_v0  ;;  %671 = vmatprep.subr.mxu1 %v914_v0 }
  0x6c   : > { %637 = vmatpush3.msra.mxu0 %v275_v15  ;;  %672 = vmatpush3.msra.mxu1 %v372_v28 }
  0x6d   : > { %638 = vmatprep.subr.mxu0 %v914_v0  ;;  %673 = vmatprep.subr.mxu1 %v914_v0 }
  0x6e   : > { %639 = vmatpush3.msra.mxu0 %v274_v16  ;;  %674 = vmatpush3.msra.mxu1 %v371_v29 }
  0x6f   : > { %640 = vmatprep.subr.mxu0 %v914_v0  ;;  %675 = vmatprep.subr.mxu1 %v914_v0 }
  0x70   : > { %641 = vmatpush3.msra.mxu0 %v273_v17  ;;  %676 = vmatpush3.msra.mxu1 %v370_v30 }
  0x71   : > { %642 = vmatprep.subr.mxu0 %v914_v0  ;;  %677 = vmatprep.subr.mxu1 %v914_v0 }
  0x72   : > { %643 = vmatpush3.msra.mxu0 %v272_v18  ;;  %678 = vmatpush3.msra.mxu1 %v369_v31 }
  0x73   : > { %644 = vmatprep.subr.mxu0 %v914_v0  ;;  %679 = vmatprep.subr.mxu1 %v914_v0 }
  0x74   : > { %645 = vmatpush3.msra.mxu0 %v271_v19  ;;  %680 = vmatpush3.msra.mxu1 %v368_v32 }
  0x75   : > { %646 = vmatprep.subr.mxu0 %v914_v0  ;;  %681 = vmatprep.subr.mxu1 %v914_v0 }
  0x76   : > { %647 = vmatpush3.msra.mxu0 %v270_v20  ;;  %682 = vmatpush3.msra.mxu1 %v367_v33 }
  0x77   : > { %649 = vmatmul.mubr.f32.vlgmr.msra.gmra.mxu0 %v269_v21 }
 0x137   : > { %v359_v35 = vpop.f32.mrf.mxu0 }
 0x138   : > { %v360_v36 = vadd.f32 %v576_v34, %v359_v35 }
 0x139   : > { %v650_v37 = vpop.f32.mrf.mxu0 }
 0x13a   : > { %v363_v38 = vmul.f32 0.5, %v360_v36 }
 0x13c   : > { %757 = vtanh.f32 %v363_v38 }
 0x149   : > { %v758_v39 = vpop.eup %757 }
 0x14a   : > { %v365_v40 = vmul.f32 0.5, %v758_v39 }
 0x14c   : > { %v366_v41 = vadd.f32 0.5, %v365_v40 }
 0x14e   : > { %684 = vmatmul.mubr.f32.vlgmr.msra.gmra.mxu1 %v366_v41 }
 0x20e   : > { %v456_v43 = vpop.f32.mrf.mxu1 }
 0x20f   : > { %v457_v44 = vadd.f32 %v577_v42, %v456_v43 }
 0x210   : > { %v685_v45 = vpop.f32.mrf.mxu1 }
 0x211   : > { %460 = vst [vmem:[%s268_s12] sm:$0xff] %v457_v44 }
 0x212   : > { %852 = shalt.err (!%p849_p9)
}
 0x213   : > { %s853_s17 = scalar_lea.hbm %s1127_s28, 128  ;;  %s857_s26 = scalar_lea.hbm %s1168_s5, 384 }
 0x214   : > { %p854_p12 = scmp.ne.s32.totalorder %s1127_s28, %s853_s17  ;;  %p858_p4 = scmp.lt.s32.totalorder %s1127_s28, %s1168_s5 }
 0x215   : > { %p859_p8 = scmp.lt.s32.totalorder %s857_s26, %s853_s17 }
 0x216   : > { %p855_p3 = pnand %p854_p12, %p1184_p13 }
 0x217   : > { %p860_p5 = por %p859_p8, %p858_p4 }
 0x218   : > { %p856_p0 = pneg %p855_p3 }
 0x21a   : > { %p861_p10 = pnand %p860_p5, %p856_p0 }
 0x21c   : > { %864 = shalt.err (!%p861_p10)
}
 0x21d   : > { %696 = dma.vmem_to_hbm [thread:$0]  (%p1184_p13), %s476_s30, 128, %s1127_s28, %s462_s7  }
 0x21e PF: > { %p718_p1 = scmp.ge.s32.totalorder %s907_s21, 2  ;;  %s487_s11 = sand.u32 1, %s895_s18  }
 0x21f   : > { %p1185_p2 = scmp.ne.s32.totalorder %s1174_s25, 0  ;;  %s488_s12 = scalar_lea.sflag [#allocation4], %s487_s11 }
 0x221   : > { %p710_p6 = pnand %p718_p1, %p1185_p2 }
 0x223   : > { %p711_p11 = pneg %p710_p6 }
 0x225   : > { %890 = dma.done.wait (%p711_p11), %s488_s12, 128  }
 0x226   : > { %892 = vsyncadd (%p711_p11), %s488_s12, 4294967168  ;;  %p19_p7 = scmp.ge.s32.totalorder %s1018_s15, 5   ;;  %s1186_s18 = smov %s899_s19 }
 0x227   : > { %s1187_s19 = smov %s903_s20  ;;  %s1188_s20 = smov %s1034_s27 }
 0x228   : > { %s1189_s21 = smov %s1018_s15  ;;  %21 = sbr.rel (!%p19_p7) target bundleno = 6 (0x6), region = 93 }
 0x22d   :  { %493 = vsyncpa [#allocation3], 1 }
 0x22e   :  { %495 = vsyncpa [#allocation3 + $0x1], 1 }
 0x22f   :  { %496 = vsyncpa [#allocation6], 1 }
 0x230   :  { %497 = vsyncpa [#allocation4], 1 }
 0x231   :  { %499 = vsyncpa [#allocation4 + $0x1], 1 }

</bundles_post_ra>
